<compile_context>
chip_gen: v7x
topology: tpu7x:2x2x1
jax: 0.10.0
libtpu: 0.0.40
codegen_flags: <defaults>
</compile_context>

<pallas_src>
import functools

import jax
import jax.numpy as jnp
from jax import lax
from jax.experimental import pallas as pl
from jax.experimental.pallas import tpu as pltpu

EPS = 1e-5


def _round_up(a, b):
  return (a + b - 1) // b * b


def shortest_path_kernel(
    # graph inputs
    x_ref, ea_ref, src_ref, dst_ref,
    # lin_in
    w_in_ref, b_in_ref,
    # per-layer fused weight stacks (all VMEM-resident)
    Wij_ref, Ae_ref, ab_ref,     # mlp_msg linear1: [Ai | Aj] (D,2D), edge row, bias (+BN folded)
    Bm_ref, bb_ref,              # mlp_msg linear2 (+BN folded)
    Wu1_ref, cb_ref,             # mlp_update linear1: [Ch ; Ca] (2D,D), bias (+BN folded)
    Du_ref, db_ref,              # mlp_update linear2 (+BN folded)
    # output head
    O1_ref, o1b_ref, O2t_ref, o2b_ref,
    # output
    out_ref,
    # scratch
    oh_dst_ref, oh_src_ref, m_ref,
    *, edge_tile):
  f32, bf16 = jnp.float32, jnp.bfloat16
  N, in_dim = x_ref.shape
  E_pad = ea_ref.shape[0]
  L, D = Bm_ref.shape[0], Bm_ref.shape[1]
  edge_dim = Ae_ref.shape[1]
  n_chunks = E_pad // edge_tile          # static

  # ---- loop-invariant gather/scatter operators (built once).  Padded edges carry
  #      src/dst = -1 -> all-zero one-hot rows -> they never contribute.
  node_iota = lax.broadcasted_iota(jnp.int32, (E_pad, N), 1)
  oh_dst_ref[...] = (node_iota == dst_ref[...]).astype(f32)
  oh_src_ref[...] = (node_iota == src_ref[...]).astype(f32)

  # ---- lin_in ----
  if in_dim == 1:
    h0 = x_ref[...] * w_in_ref[...] + b_in_ref[...]      # K=1: VPU broadcast, skip the MXU
  else:
    h0 = jnp.dot(x_ref[...], w_in_ref[...], preferred_element_type=f32) + b_in_ref[...]

  def layer(l, h):
    # --- message MLP: project on N rows first (single fused [Ai|Aj] dot), then gather
    #     the already-projected rows on E rows.
    p = jnp.dot(h.astype(bf16), Wij_ref[l], preferred_element_type=f32)        # (N, 2D)
    m = (jnp.dot(oh_dst_ref[...], p[:, :D], preferred_element_type=f32)        # h_i @ Ai
         + jnp.dot(oh_src_ref[...], p[:, D:], preferred_element_type=f32))     # h_j @ Aj
    if edge_dim == 1:
      m = m + ea_ref[...] * Ae_ref[l]          # K=1 outer product -> VPU broadcast multiply
    else:
      m = m + jnp.dot(ea_ref[...], Ae_ref[l], preferred_element_type=f32)
    m = jnp.maximum(m + ab_ref[l], 0.0)
    m = jnp.maximum(jnp.dot(m.astype(bf16), Bm_ref[l], preferred_element_type=f32)
                    + bb_ref[l], 0.0)          # (E_pad, D), >= 0 after ReLU
    m_ref[...] = m                             # stage messages in VMEM for the reduction

    # --- aggregation: chunked running scatter-max over destination nodes, streamed from
    #     refs so only a (TE, N, D) intermediate is ever live in vregs.
    #     m >= 0, so the 0-init masked max matches the reference -inf scatter_max rule.
    def agg_chunk(c, aggr):
      lo = pl.multiple_of(c * edge_tile, edge_tile)
      oh_c = oh_dst_ref[pl.ds(lo, edge_tile), :]          # (TE, N) f32
      m_c = m_ref[pl.ds(lo, edge_tile), :]                # (TE, D) f32
      return jnp.maximum(aggr, jnp.max(oh_c[:, :, None] * m_c[:, None, :], axis=0))

    aggr = lax.fori_loop(0, n_chunks, agg_chunk, jnp.zeros((N, D), f32))

    # --- update MLP: fused concat([h, aggr]) @ vstack([Ch, Ca]) (K = 2D) ---
    hu = jnp.concatenate([h, aggr], axis=-1).astype(bf16)                      # (N, 2D)
    u = jnp.maximum(jnp.dot(hu, Wu1_ref[l], preferred_element_type=f32) + cb_ref[l], 0.0)
    u = jnp.maximum(jnp.dot(u.astype(bf16), Du_ref[l], preferred_element_type=f32)
                    + db_ref[l], 0.0)
    return h + u                               # residual connection, f32 carry

  h = lax.fori_loop(0, L, layer, h0)

  # ---- output head ----
  o = jnp.maximum(jnp.dot(h.astype(bf16), O1_ref[...], preferred_element_type=f32)
                  + o1b_ref[...], 0.0)
  # final (D -> 1) projection as a lane reduction instead of an N=1-column MXU dot
  out_ref[...] = jnp.sum(o * O2t_ref[...], axis=-1, keepdims=True) + o2b_ref[...]


def shortest_path_forward(x, edge_index, edge_attr, params):
  (W_in, b_in, Ai, Aj, Ae, ab, Bm, bb, Ch, Ca, cb, Du, db, O1, o1b, O2, o2b) = params
  f32, bf16 = jnp.float32, jnp.bfloat16
  N, in_dim = x.shape
  E, edge_dim = edge_attr.shape
  L, D = Ai.shape[0], Ai.shape[2]

  # Host-side fused weight stacks (one dot instead of two for message / update linear1).
  Wij = jnp.concatenate([Ai, Aj], axis=2).astype(bf16)     # (L, D, 2D)
  Wu1 = jnp.concatenate([Ch, Ca], axis=1).astype(bf16)     # (L, 2D, D)
  Bm_b, Du_b, O1_b = Bm.astype(bf16), Du.astype(bf16), O1.astype(bf16)
  O2t = jnp.reshape(O2, (1, D))                            # (D,1) -> (1,D) row for lane reduce

  # edge_tile: keep the (TE, N, D) masked-max intermediate around <= 32 KiB of f32 vregs.
  TE = max(8, min(128, ((32 * 1024) // max(1, N * D * 4)) // 8 * 8))
  E_pad = _round_up(max(E, TE), TE)
  pad = E_pad - E
  # Padded edges: src/dst = -1 (all-zero one-hot rows) and zero features -> no contribution.
  src = jnp.pad(edge_index[0].astype(jnp.int32), (0, pad), constant_values=-1)[:, None]
  dst = jnp.pad(edge_index[1].astype(jnp.int32), (0, pad), constant_values=-1)[:, None]
  ea = jnp.pad(edge_attr.astype(f32), ((0, pad), (0, 0)))

  args = (x.astype(f32), ea, src, dst, W_in, b_in,
          Wij, Ae, ab, Bm_b, bb, Wu1, cb, Du_b, db,
          O1_b, o1b, O2t, o2b)

  scratch = [
      pltpu.VMEM((E_pad, N), f32),   # dst one-hot (f32: exact, no per-chunk unpack on v5e)
      pltpu.VMEM((E_pad, N), f32),   # src one-hot
      pltpu.VMEM((E_pad, D), f32),   # per-layer message buffer (aggregation streams from it)
  ]

  # Everything is VMEM-resident (no grid); size the scoped-VMEM limit from the actual
  # footprint with headroom, but stay under v7x's 64 MiB physical VMEM.
  in_bytes = sum(int(a.size) * a.dtype.itemsize for a in args)
  scr_bytes = 2 * E_pad * N * 4 + E_pad * D * 4
  vmem_limit = int(min(max(2 * (in_bytes + scr_bytes) + (8 << 20), 16 << 20), 48 << 20))

  out = pl.pallas_call(
      functools.partial(shortest_path_kernel, edge_tile=TE),
      out_shape=jax.ShapeDtypeStruct((N, 1), f32),
      scratch_shapes=scratch,
      compiler_params=pltpu.CompilerParams(vmem_limit_bytes=vmem_limit),
  )(*args)
  return out[:, 0]   # squeeze(-1)


def init_params(key, num_layers=4, emb_dim=32, in_dim=1, edge_dim=1):
  keys = iter(jax.random.split(key, 256))

  def linear(fan_in, fan_out):
    bound = float(fan_in) ** -0.5
    W = jax.random.uniform(next(keys), (fan_in, fan_out), jnp.float32, -bound, bound)
    b = jax.random.uniform(next(keys), (1, fan_out), jnp.float32, -bound, bound)
    return W, b

  def bn(dim):
    g = 1.0 + 0.1 * jax.random.normal(next(keys), (1, dim), jnp.float32)
    bt = 0.1 * jax.random.normal(next(keys), (1, dim), jnp.float32)
    mu = 0.1 * jax.random.normal(next(keys), (1, dim), jnp.float32)
    var = 1.0 + 0.1 * jnp.abs(jax.random.normal(next(keys), (1, dim), jnp.float32))
    return g, bt, mu, var

  def fold(W, b, bnp):
    g, bt, mu, var = bnp
    s = g / jnp.sqrt(var + EPS)
    return W * s, (b - mu) * s + bt

  D = emb_dim
  W_in, b_in = linear(in_dim, D)

  Ai, Aj, Ae, ab, Bm, bb = [], [], [], [], [], []
  Ch, Ca, cb, Du, db = [], [], [], [], []
  for _ in range(num_layers):
    Wm1, bm1 = fold(*linear(2 * D + edge_dim, D), bn(D))
    Ai.append(Wm1[:D]); Aj.append(Wm1[D:2 * D]); Ae.append(Wm1[2 * D:]); ab.append(bm1)
    Wm2, bm2 = fold(*linear(D, D), bn(D))
    Bm.append(Wm2); bb.append(bm2)
    Wu1, bu1 = fold(*linear(2 * D, D), bn(D))
    Ch.append(Wu1[:D]); Ca.append(Wu1[D:]); cb.append(bu1)
    Wu2, bu2 = fold(*linear(D, D), bn(D))
    Du.append(Wu2); db.append(bu2)

  O1, o1b = fold(*linear(D, D), bn(D))
  O2, o2b = linear(D, 1)

  st = lambda xs: jnp.stack(xs, axis=0)
  return (W_in, b_in,
          st(Ai), st(Aj), st(Ae), st(ab), st(Bm), st(bb),
          st(Ch), st(Ca), st(cb), st(Du), st(db),
          O1, o1b, O2, o2b)


def reference_forward(params, x, edge_attr, src, dst):
  """Pure-JAX f32 reference with the original -inf scatter_max semantics."""
  (W_in, b_in, Ai, Aj, Ae, ab, Bm, bb, Ch, Ca, cb, Du, db, O1, o1b, O2, o2b) = params
  N = x.shape[0]
  h = x @ W_in + b_in
  oh_src = (src[:, None] == jnp.arange(N)[None, :]).astype(jnp.float32)
  oh_dst = (dst[:, None] == jnp.arange(N)[None, :]).astype(jnp.float32)
  for l in range(Ai.shape[0]):
    h_i = oh_dst @ h
    h_j = oh_src @ h
    m = jnp.maximum(h_i @ Ai[l] + h_j @ Aj[l] + edge_attr @ Ae[l] + ab[l], 0.0)
    m = jnp.maximum(m @ Bm[l] + bb[l], 0.0)
    masked = jnp.where(oh_dst[:, :, None] > 0.5, m[:, None, :], -jnp.inf)
    aggr = masked.max(axis=0)
    aggr = jnp.where(jnp.isneginf(aggr), 0.0, aggr)
    u = jnp.maximum(h @ Ch[l] + aggr @ Ca[l] + cb[l], 0.0)
    u = jnp.maximum(u @ Du[l] + db[l], 0.0)
    h = h + u
  o = jnp.maximum(h @ O1 + o1b, 0.0)
  return (o @ O2 + o2b)[:, 0]


if __name__ == "__main__":
  key = jax.random.PRNGKey(0)
  N, E, D, L = 16, 32, 32, 4   # num_nodes, num_edges, emb_dim, num_layers
  k1, k2, k3, kp = jax.random.split(key, 4)

  x = jax.random.normal(k1, (N, 1), jnp.float32)                 # node feature = source flag
  edge_index = jax.random.randint(k2, (2, E), 0, N, jnp.int32)   # COO connectivity
  edge_attr = jax.random.uniform(k3, (E, 1), jnp.float32)        # edge weights
  params = init_params(kp, num_layers=L, emb_dim=D, in_dim=1, edge_dim=1)

  out = shortest_path_forward(x, edge_index, edge_attr, params)
  out = jax.block_until_ready(out)

  ref = reference_forward(params, x, edge_attr, edge_index[0], edge_index[1])
  assert out.shape == (N,)
  # 5e-2 tolerance absorbs bf16 MXU-operand quantization vs. the f32 reference.
  assert jnp.allclose(out, ref, rtol=5e-2, atol=5e-2), (out, ref)
  print("KERNEL_OK")
</pallas_src>

<mosaic_0001>
module attributes {stable_mosaic.version = 11 : i64} {
  func.func @shortest_path_kernel(%arg0: memref<16x1xf32, #tpu.memory_space<vmem>>, %arg1: memref<32x1xf32, #tpu.memory_space<vmem>>, %arg2: memref<32x1xi32, #tpu.memory_space<vmem>>, %arg3: memref<32x1xi32, #tpu.memory_space<vmem>>, %arg4: memref<1x32xf32, #tpu.memory_space<vmem>>, %arg5: memref<1x32xf32, #tpu.memory_space<vmem>>, %arg6: memref<4x32x64xbf16, #tpu.memory_space<vmem>>, %arg7: memref<4x1x32xf32, #tpu.memory_space<vmem>>, %arg8: memref<4x1x32xf32, #tpu.memory_space<vmem>>, %arg9: memref<4x32x32xbf16, #tpu.memory_space<vmem>>, %arg10: memref<4x1x32xf32, #tpu.memory_space<vmem>>, %arg11: memref<4x64x32xbf16, #tpu.memory_space<vmem>>, %arg12: memref<4x1x32xf32, #tpu.memory_space<vmem>>, %arg13: memref<4x32x32xbf16, #tpu.memory_space<vmem>>, %arg14: memref<4x1x32xf32, #tpu.memory_space<vmem>>, %arg15: memref<32x32xbf16, #tpu.memory_space<vmem>>, %arg16: memref<1x32xf32, #tpu.memory_space<vmem>>, %arg17: memref<1x32xf32, #tpu.memory_space<vmem>>, %arg18: memref<1x1xf32, #tpu.memory_space<vmem>>, %arg19: memref<16x1xf32, #tpu.memory_space<vmem>>, %arg20: memref<32x16xf32, #tpu.memory_space<vmem>>, %arg21: memref<32x16xf32, #tpu.memory_space<vmem>>, %arg22: memref<32x32xf32, #tpu.memory_space<vmem>>) attributes {dimension_semantics = [], scalar_prefetch = 0 : i64, scratch_operands = 3 : i64, tpu.core_type = #tpu.core_type<tc>} {
    %0 = tpu.iota {dimensions = array<i32: 1>} : vector<32x16xi32>
    %c0 = arith.constant 0 : index
    %c0_0 = arith.constant 0 : index
    %1 = vector.load %arg3[%c0, %c0_0] : memref<32x1xi32, #tpu.memory_space<vmem>>, vector<32x1xi32>
    %2 = vector.broadcast %1 : vector<32x1xi32> to vector<32x16xi32>
    %3 = arith.cmpi eq, %0, %2 : vector<32x16xi32>
    %4 = arith.extui %3 : vector<32x16xi1> to vector<32x16xi32>
    %5 = arith.sitofp %4 : vector<32x16xi32> to vector<32x16xf32>
    %c0_1 = arith.constant 0 : index
    %c0_2 = arith.constant 0 : index
    %6 = vector.load %arg20[%c0_1, %c0_2] : memref<32x16xf32, #tpu.memory_space<vmem>>, vector<32x16xf32>
    tpu.vector_store %arg20[%c0_1, %c0_2], %5 {strides = array<i32>} : memref<32x16xf32, #tpu.memory_space<vmem>>, vector<32x16xf32>,
    %c0_3 = arith.constant 0 : index
    %c0_4 = arith.constant 0 : index
    %7 = vector.load %arg2[%c0_3, %c0_4] : memref<32x1xi32, #tpu.memory_space<vmem>>, vector<32x1xi32>
    %8 = vector.broadcast %7 : vector<32x1xi32> to vector<32x16xi32>
    %9 = arith.cmpi eq, %0, %8 : vector<32x16xi32>
    %10 = arith.extui %9 : vector<32x16xi1> to vector<32x16xi32>
    %11 = arith.sitofp %10 : vector<32x16xi32> to vector<32x16xf32>
    %c0_5 = arith.constant 0 : index
    %c0_6 = arith.constant 0 : index
    %12 = vector.load %arg21[%c0_5, %c0_6] : memref<32x16xf32, #tpu.memory_space<vmem>>, vector<32x16xf32>
    tpu.vector_store %arg21[%c0_5, %c0_6], %11 {strides = array<i32>} : memref<32x16xf32, #tpu.memory_space<vmem>>, vector<32x16xf32>,
    %c0_7 = arith.constant 0 : index
    %c0_8 = arith.constant 0 : index
    %13 = vector.load %arg0[%c0_7, %c0_8] : memref<16x1xf32, #tpu.memory_space<vmem>>, vector<16x1xf32>
    %c0_9 = arith.constant 0 : index
    %c0_10 = arith.constant 0 : index
    %14 = vector.load %arg4[%c0_9, %c0_10] : memref<1x32xf32, #tpu.memory_space<vmem>>, vector<1x32xf32>
    %15 = vector.broadcast %13 : vector<16x1xf32> to vector<16x32xf32>
    %16 = vector.broadcast %14 : vector<1x32xf32> to vector<16x32xf32>
    %17 = arith.mulf %15, %16 : vector<16x32xf32>
    %c0_11 = arith.constant 0 : index
    %c0_12 = arith.constant 0 : index
    %18 = vector.load %arg5[%c0_11, %c0_12] : memref<1x32xf32, #tpu.memory_space<vmem>>, vector<1x32xf32>
    %19 = vector.broadcast %18 : vector<1x32xf32> to vector<16x32xf32>
    %20 = arith.addf %17, %19 : vector<16x32xf32>
    %c0_i32 = arith.constant 0 : i32
    %c4_i32 = arith.constant 4 : i32
    %21 = arith.addi %c0_i32, %c4_i32 : i32
    %c1_i32 = arith.constant 1 : i32
    %22 = scf.for %arg23 = %c0_i32 to %21 step %c1_i32 iter_args(%arg24 = %20) -> (vector<16x32xf32>)  : i32 {
      %40 = arith.truncf %arg24 : vector<16x32xf32> to vector<16x32xbf16>
      %41 = arith.index_cast %arg23 : i32 to index
      %c0_26 = arith.constant 0 : index
      %c0_27 = arith.constant 0 : index
      %42 = vector.load %arg6[%41, %c0_26, %c0_27] : memref<4x32x64xbf16, #tpu.memory_space<vmem>>, vector<1x32x64xbf16>
      %43 = vector.shape_cast %42 : vector<1x32x64xbf16> to vector<32x64xbf16>
      %cst_28 = arith.constant dense<0.000000e+00> : vector<16x64xf32>
      %44 = tpu.matmul %40, %43, %cst_28 {dimension_numbers = #tpu.dot_dimension_numbers<[1], [0], [0], [1], [0, 0, 1, 1], [], []>} : vector<16x32xbf16>, vector<32x64xbf16>, vector<16x64xf32> -> vector<16x64xf32>
      %c0_29 = arith.constant 0 : index
      %c0_30 = arith.constant 0 : index
      %45 = vector.load %arg20[%c0_29, %c0_30] : memref<32x16xf32, #tpu.memory_space<vmem>>, vector<32x16xf32>
      %46 = vector.extract_strided_slice %44 {offsets = [0, 0], sizes = [16, 32], strides = [1, 1]} : vector<16x64xf32> to vector<16x32xf32>
      %cst_31 = arith.constant dense<0.000000e+00> : vector<32x32xf32>
      %47 = tpu.matmul %45, %46, %cst_31 {dimension_numbers = #tpu.dot_dimension_numbers<[1], [0], [0], [1], [0, 0, 1, 1], [], []>} : vector<32x16xf32>, vector<16x32xf32>, vector<32x32xf32> -> vector<32x32xf32>
      %c0_32 = arith.constant 0 : index
      %c0_33 = arith.constant 0 : index
      %48 = vector.load %arg21[%c0_32, %c0_33] : memref<32x16xf32, #tpu.memory_space<vmem>>, vector<32x16xf32>
      %49 = vector.extract_strided_slice %44 {offsets = [0, 32], sizes = [16, 32], strides = [1, 1]} : vector<16x64xf32> to vector<16x32xf32>
      %cst_34 = arith.constant dense<0.000000e+00> : vector<32x32xf32>
      %50 = tpu.matmul %48, %49, %cst_34 {dimension_numbers = #tpu.dot_dimension_numbers<[1], [0], [0], [1], [0, 0, 1, 1], [], []>} : vector<32x16xf32>, vector<16x32xf32>, vector<32x32xf32> -> vector<32x32xf32>
      %51 = arith.addf %47, %50 : vector<32x32xf32>
      %c0_35 = arith.constant 0 : index
      %c0_36 = arith.constant 0 : index
      %52 = vector.load %arg1[%c0_35, %c0_36] : memref<32x1xf32, #tpu.memory_space<vmem>>, vector<32x1xf32>
      %53 = arith.index_cast %arg23 : i32 to index
      %c0_37 = arith.constant 0 : index
      %c0_38 = arith.constant 0 : index
      %54 = vector.load %arg7[%53, %c0_37, %c0_38] : memref<4x1x32xf32, #tpu.memory_space<vmem>>, vector<1x1x32xf32>
      %55 = vector.shape_cast %54 : vector<1x1x32xf32> to vector<1x32xf32>
      %56 = vector.broadcast %52 : vector<32x1xf32> to vector<32x32xf32>
      %57 = vector.broadcast %55 : vector<1x32xf32> to vector<32x32xf32>
      %58 = arith.mulf %56, %57 : vector<32x32xf32>
      %59 = arith.addf %51, %58 : vector<32x32xf32>
      %60 = arith.index_cast %arg23 : i32 to index
      %c0_39 = arith.constant 0 : index
      %c0_40 = arith.constant 0 : index
      %61 = vector.load %arg8[%60, %c0_39, %c0_40] : memref<4x1x32xf32, #tpu.memory_space<vmem>>, vector<1x1x32xf32>
      %62 = vector.shape_cast %61 : vector<1x1x32xf32> to vector<1x32xf32>
      %63 = vector.broadcast %62 : vector<1x32xf32> to vector<32x32xf32>
      %64 = arith.addf %59, %63 : vector<32x32xf32>
      %cst_41 = arith.constant 0.000000e+00 : f32
      %65 = vector.broadcast %cst_41 : f32 to vector<32x32xf32>
      %66 = arith.maximumf %64, %65 : vector<32x32xf32>
      %67 = arith.truncf %66 : vector<32x32xf32> to vector<32x32xbf16>
      %68 = arith.index_cast %arg23 : i32 to index
      %c0_42 = arith.constant 0 : index
      %c0_43 = arith.constant 0 : index
      %69 = vector.load %arg9[%68, %c0_42, %c0_43] : memref<4x32x32xbf16, #tpu.memory_space<vmem>>, vector<1x32x32xbf16>
      %70 = vector.shape_cast %69 : vector<1x32x32xbf16> to vector<32x32xbf16>
      %cst_44 = arith.constant dense<0.000000e+00> : vector<32x32xf32>
      %71 = tpu.matmul %67, %70, %cst_44 {dimension_numbers = #tpu.dot_dimension_numbers<[1], [0], [0], [1], [0, 0, 1, 1], [], []>} : vector<32x32xbf16>, vector<32x32xbf16>, vector<32x32xf32> -> vector<32x32xf32>
      %72 = arith.index_cast %arg23 : i32 to index
      %c0_45 = arith.constant 0 : index
      %c0_46 = arith.constant 0 : index
      %73 = vector.load %arg10[%72, %c0_45, %c0_46] : memref<4x1x32xf32, #tpu.memory_space<vmem>>, vector<1x1x32xf32>
      %74 = vector.shape_cast %73 : vector<1x1x32xf32> to vector<1x32xf32>
      %75 = vector.broadcast %74 : vector<1x32xf32> to vector<32x32xf32>
      %76 = arith.addf %71, %75 : vector<32x32xf32>
      %cst_47 = arith.constant 0.000000e+00 : f32
      %77 = vector.broadcast %cst_47 : f32 to vector<32x32xf32>
      %78 = arith.maximumf %76, %77 : vector<32x32xf32>
      %c0_48 = arith.constant 0 : index
      %c0_49 = arith.constant 0 : index
      %79 = vector.load %arg22[%c0_48, %c0_49] : memref<32x32xf32, #tpu.memory_space<vmem>>, vector<32x32xf32>
      tpu.vector_store %arg22[%c0_48, %c0_49], %78 {strides = array<i32>} : memref<32x32xf32, #tpu.memory_space<vmem>>, vector<32x32xf32>,
      %cst_50 = arith.constant 0.000000e+00 : f32
      %80 = vector.broadcast %cst_50 : f32 to vector<16x32xf32>
      %c0_i32_51 = arith.constant 0 : i32
      %c2_i32 = arith.constant 2 : i32
      %81 = arith.addi %c0_i32_51, %c2_i32 : i32
      %c1_i32_52 = arith.constant 1 : i32
      %82 = scf.for %arg25 = %c0_i32_51 to %81 step %c1_i32_52 iter_args(%arg26 = %80) -> (vector<16x32xf32>)  : i32 {
        %c16_i32 = arith.constant 16 : i32
        %109 = arith.muli %arg25, %c16_i32 : i32
        %110 = tpu.assume_multiple %109, 16 : i32
        %111 = arith.index_cast %110 : i32 to index
        %c0_66 = arith.constant 0 : index
        %112 = vector.load %arg20[%111, %c0_66] : memref<32x16xf32, #tpu.memory_space<vmem>>, vector<16x16xf32>
        %113 = arith.index_cast %110 : i32 to index
        %c0_67 = arith.constant 0 : index
        %114 = vector.load %arg22[%113, %c0_67] : memref<32x32xf32, #tpu.memory_space<vmem>>, vector<16x32xf32>
        %115 = vector.shape_cast %112 : vector<16x16xf32> to vector<16x16x1xf32>
        %116 = vector.shape_cast %114 : vector<16x32xf32> to vector<16x1x32xf32>
        %117 = vector.broadcast %115 : vector<16x16x1xf32> to vector<16x16x32xf32>
        %118 = vector.broadcast %116 : vector<16x1x32xf32> to vector<16x16x32xf32>
        %119 = arith.mulf %117, %118 : vector<16x16x32xf32>
        %cst_68 = arith.constant dense<0xFF800000> : vector<16x32xf32>
        %120 = vector.multi_reduction <maximumf>, %119, %cst_68 [0] : vector<16x16x32xf32> to vector<16x32xf32>
        %121 = arith.maximumf %arg26, %120 : vector<16x32xf32>
        scf.yield %121 : vector<16x32xf32>
      }
      %c2_i32_53 = arith.constant 2 : i32
      %83 = tpu.concatenate %arg24, %82 in 1 : vector<16x32xf32>, vector<16x32xf32> -> vector<16x64xf32>
      %84 = arith.truncf %83 : vector<16x64xf32> to vector<16x64xbf16>
      %85 = arith.index_cast %arg23 : i32 to index
      %c0_54 = arith.constant 0 : index
      %c0_55 = arith.constant 0 : index
      %86 = vector.load %arg11[%85, %c0_54, %c0_55] : memref<4x64x32xbf16, #tpu.memory_space<vmem>>, vector<1x64x32xbf16>
      %87 = vector.shape_cast %86 : vector<1x64x32xbf16> to vector<64x32xbf16>
      %cst_56 = arith.constant dense<0.000000e+00> : vector<16x32xf32>
      %88 = tpu.matmul %84, %87, %cst_56 {dimension_numbers = #tpu.dot_dimension_numbers<[1], [0], [0], [1], [0, 0, 1, 1], [], []>} : vector<16x64xbf16>, vector<64x32xbf16>, vector<16x32xf32> -> vector<16x32xf32>
      %89 = arith.index_cast %arg23 : i32 to index
      %c0_57 = arith.constant 0 : index
      %c0_58 = arith.constant 0 : index
      %90 = vector.load %arg12[%89, %c0_57, %c0_58] : memref<4x1x32xf32, #tpu.memory_space<vmem>>, vector<1x1x32xf32>
      %91 = vector.shape_cast %90 : vector<1x1x32xf32> to vector<1x32xf32>
      %92 = vector.broadcast %91 : vector<1x32xf32> to vector<16x32xf32>
      %93 = arith.addf %88, %92 : vector<16x32xf32>
      %cst_59 = arith.constant 0.000000e+00 : f32
      %94 = vector.broadcast %cst_59 : f32 to vector<16x32xf32>
      %95 = arith.maximumf %93, %94 : vector<16x32xf32>
      %96 = arith.truncf %95 : vector<16x32xf32> to vector<16x32xbf16>
      %97 = arith.index_cast %arg23 : i32 to index
      %c0_60 = arith.constant 0 : index
      %c0_61 = arith.constant 0 : index
      %98 = vector.load %arg13[%97, %c0_60, %c0_61] : memref<4x32x32xbf16, #tpu.memory_space<vmem>>, vector<1x32x32xbf16>
      %99 = vector.shape_cast %98 : vector<1x32x32xbf16> to vector<32x32xbf16>
      %cst_62 = arith.constant dense<0.000000e+00> : vector<16x32xf32>
      %100 = tpu.matmul %96, %99, %cst_62 {dimension_numbers = #tpu.dot_dimension_numbers<[1], [0], [0], [1], [0, 0, 1, 1], [], []>} : vector<16x32xbf16>, vector<32x32xbf16>, vector<16x32xf32> -> vector<16x32xf32>
      %101 = arith.index_cast %arg23 : i32 to index
      %c0_63 = arith.constant 0 : index
      %c0_64 = arith.constant 0 : index
      %102 = vector.load %arg14[%101, %c0_63, %c0_64] : memref<4x1x32xf32, #tpu.memory_space<vmem>>, vector<1x1x32xf32>
      %103 = vector.shape_cast %102 : vector<1x1x32xf32> to vector<1x32xf32>
      %104 = vector.broadcast %103 : vector<1x32xf32> to vector<16x32xf32>
      %105 = arith.addf %100, %104 : vector<16x32xf32>
      %cst_65 = arith.constant 0.000000e+00 : f32
      %106 = vector.broadcast %cst_65 : f32 to vector<16x32xf32>
      %107 = arith.maximumf %105, %106 : vector<16x32xf32>
      %108 = arith.addf %arg24, %107 : vector<16x32xf32>
      scf.yield %108 : vector<16x32xf32>
    }
    %c4_i32_13 = arith.constant 4 : i32
    %23 = arith.truncf %22 : vector<16x32xf32> to vector<16x32xbf16>
    %c0_14 = arith.constant 0 : index
    %c0_15 = arith.constant 0 : index
    %24 = vector.load %arg15[%c0_14, %c0_15] : memref<32x32xbf16, #tpu.memory_space<vmem>>, vector<32x32xbf16>
    %cst = arith.constant dense<0.000000e+00> : vector<16x32xf32>
    %25 = tpu.matmul %23, %24, %cst {dimension_numbers = #tpu.dot_dimension_numbers<[1], [0], [0], [1], [0, 0, 1, 1], [], []>} : vector<16x32xbf16>, vector<32x32xbf16>, vector<16x32xf32> -> vector<16x32xf32>
    %c0_16 = arith.constant 0 : index
    %c0_17 = arith.constant 0 : index
    %26 = vector.load %arg16[%c0_16, %c0_17] : memref<1x32xf32, #tpu.memory_space<vmem>>, vector<1x32xf32>
    %27 = vector.broadcast %26 : vector<1x32xf32> to vector<16x32xf32>
    %28 = arith.addf %25, %27 : vector<16x32xf32>
    %cst_18 = arith.constant 0.000000e+00 : f32
    %29 = vector.broadcast %cst_18 : f32 to vector<16x32xf32>
    %30 = arith.maximumf %28, %29 : vector<16x32xf32>
    %c0_19 = arith.constant 0 : index
    %c0_20 = arith.constant 0 : index
    %31 = vector.load %arg17[%c0_19, %c0_20] : memref<1x32xf32, #tpu.memory_space<vmem>>, vector<1x32xf32>
    %32 = vector.broadcast %31 : vector<1x32xf32> to vector<16x32xf32>
    %33 = arith.mulf %30, %32 : vector<16x32xf32>
    %cst_21 = arith.constant dense<0.000000e+00> : vector<16xf32>
    %34 = vector.multi_reduction <add>, %33, %cst_21 [1] : vector<16x32xf32> to vector<16xf32>
    %35 = vector.shape_cast %34 : vector<16xf32> to vector<16x1xf32>
    %c0_22 = arith.constant 0 : index
    %c0_23 = arith.constant 0 : index
    %36 = vector.load %arg18[%c0_22, %c0_23] : memref<1x1xf32, #tpu.memory_space<vmem>>, vector<1x1xf32>
    %37 = vector.broadcast %36 : vector<1x1xf32> to vector<16x1xf32>
    %38 = arith.addf %35, %37 : vector<16x1xf32>
    %c0_24 = arith.constant 0 : index
    %c0_25 = arith.constant 0 : index
    %39 = vector.load %arg19[%c0_24, %c0_25] : memref<16x1xf32, #tpu.memory_space<vmem>>, vector<16x1xf32>
    tpu.vector_store %arg19[%c0_24, %c0_25], %38 {strides = array<i32>} : memref<16x1xf32, #tpu.memory_space<vmem>>, vector<16x1xf32>,
    return
  }
}

</mosaic_0001>

<bundles_post_ra>
// kernel: tpu_custom_call.1
= control target key start
LH: loop header
LB: loop body
LE: loop exit
PB: predicated region body
PF: predicated region fallthrough
CT: control target
= control target key end

     0   :  { %v1670_v0 = vmov 0   ;;  %v65_v12 = vlaneseq  ;;  %vm95_vm0 = vcmask 130048   ;;  %v1671_v16 = vmov 0.0   ;;  %s2165_s3 = inlined_call_operand.vmem [shape: s32[32,1], index: 3, kind: input, shape index: {}]   ;;  %s2166_s2 = inlined_call_operand.vmem [shape: s32[32,1], index: 2, kind: input, shape index: {}]   ;;  %s2167_s0 = inlined_call_operand.vmem [shape: f32[16,1], index: 0, kind: input, shape index: {}]   ;;  %s2168_s18 = inlined_call_operand.<no memory space> [shape: f32[1,1], index: 18, kind: input, shape index: {}]   ;;  %s2169_s1 = inlined_call_operand.vmem [shape: f32[32,1], index: 1, kind: input, shape index: {}]   ;;  %s2170_s6 = inlined_call_operand.vmem [shape: bf16[4,32,64], index: 6, kind: input, shape index: {}]   ;;  %s2171_s7 = inlined_call_operand.vmem [shape: f32[4,1,32], index: 7, kind: input, shape index: {}]   ;;  %s2172_s8 = inlined_call_operand.vmem [shape: f32[4,1,32], index: 8, kind: input, shape index: {}]   ;;  %s2173_s9 = inlined_call_operand.vmem [shape: bf16[4,32,32], index: 9, kind: input, shape index: {}]   ;;  %s2174_s10 = inlined_call_operand.vmem [shape: f32[4,1,32], index: 10, kind: input, shape index: {}]   ;;  %s2175_s11 = inlined_call_operand.vmem [shape: bf16[4,64,32], index: 11, kind: input, shape index: {}]   ;;  %s2176_s12 = inlined_call_operand.vmem [shape: f32[4,1,32], index: 12, kind: input, shape index: {}]   ;;  %s2177_s13 = inlined_call_operand.vmem [shape: bf16[4,32,32], index: 13, kind: input, shape index: {}]   ;;  %s2178_s14 = inlined_call_operand.vmem [shape: f32[4,1,32], index: 14, kind: input, shape index: {}]   ;;  %s2179_s15 = inlined_call_operand.vmem [shape: bf16[32,32], index: 15, kind: input, shape index: {}]   ;;  %s2180_s16 = inlined_call_operand.vmem [shape: f32[1,32], index: 16, kind: input, shape index: {}]   ;;  %s2181_s17 = inlined_call_operand.vmem [shape: f32[1,32], index: 17, kind: input, shape index: {}]   ;;  %s2182_s19 = inlined_call_operand.vmem [shape: f32[16,1], index: 19, kind: output, shape index: {}]   ;;  %s2183_s4 = inlined_call_operand.vmem [shape: f32[1,32], index: 4, kind: input, shape index: {}]   ;;  %s2184_s5 = inlined_call_operand.vmem [shape: f32[1,32], index: 5, kind: input, shape index: {}]  }
   0x1   :  { %2188 = sst [smem:[#allocation6_spill]] %s2165_s3  ;;  %1595 = vset.pattern.permute.xlu1 %v1670_v0  ;;  %1594 = vset.pattern.permute.xlu0 %v1670_v0  ;;  %v1384_v31 = vld [vmem:[%s2183_s4] ss:$0 sm:$0xff]  ;;  %s1839_s3 = smov 0  }
   0x2   :  { %2189 = sst [smem:[#allocation7_spill]] %s2166_s2  ;;  %s2192_s20 = sld [smem:[#allocation6_spill]]  ;;  %v66_v13 = vand.u32 127, %v65_v12  ;;  %v1385_v32 = vld [vmem:[%s2184_s5] ss:$0 sm:$0xff] }
   0x3   :  { %2190 = sst [smem:[#allocation8_spill]] %s2167_s0  ;;  %s2193_s26 = sld [smem:[#allocation7_spill]] }
   0x4   :  { %2191 = sst [smem:[#allocation9_spill]] %s2168_s18  ;;  %s2194_s22 = sld [smem:[#allocation8_spill]] }
   0x5   :  { %s2195_s18 = sld [smem:[#allocation9_spill]] }
   0x8   :  { %v69_v1 = vld [vmem:[%s2192_s20 + $0x10] sm:$0xff]  ;;  %v67_v2 = vld [vmem:[%s2192_s20] sm:$0xff]  ;;  %v70_v3 = vld [vmem:[%s2192_s20 + $0x18] sm:$0xff] }
   0x9   :  { %78 = vperm.xlu1 %1595, %v69_v1   ;;  %72 = vperm.xlu0 %1594, %v67_v2   ;;  %v68_v4 = vld [vmem:[%s2192_s20 + $0x8] sm:$0xff]  ;;  %v100_v6 = vld [vmem:[%s2193_s26] sm:$0xff]  ;;  %v103_v7 = vld [vmem:[%s2193_s26 + $0x18] sm:$0xff] }
   0xa   :  { %v101_v5 = vld [vmem:[%s2193_s26 + $0x8] sm:$0xff]  ;;  %v102_v8 = vld [vmem:[%s2193_s26 + $0x10] sm:$0xff]  ;;  %v132_v10 = vld [vmem:[%s2194_s22] sm:$0xff] }
   0xb   :  { %v133_v9 = vld [vmem:[%s2194_s22 + $0x8] sm:$0xff]  ;;  %v24_v11 = vstv %s2195_s18 }
   0xc   :  { %25 = vst [vmem:[#allocation5] sm:$0x1] %v24_v11 }
   0xd   :  { %81 = vperm.xlu1 %1595, %v70_v3   ;;  %75 = vperm.xlu0 %1594, %v68_v4  }
  0x11   :  { %108 = vperm.xlu1 %1595, %v101_v5   ;;  %105 = vperm.xlu0 %1594, %v100_v6  }
  0x15   :  { %114 = vperm.xlu1 %1595, %v103_v7   ;;  %111 = vperm.xlu0 %1594, %v102_v8  }
  0x19   :  { %142 = vperm.xlu1 %1595, %v133_v9   ;;  %137 = vperm.xlu0 %1594, %v132_v10  }
  0x88   :  { %v79_v14 = vpop.permute.xlu1 %78  ;;  %v73_v15 = vpop.permute.xlu0 %72 }
  0x89   :  { %vm85_vm1 = vcmp.eq.s32.totalorder %v66_v13, %v79_v14  ;;  %vm83_vm2 = vcmp.eq.s32.totalorder %v66_v13, %v73_v15 }
  0x8a   :  { %v1378_v17 = vsel %vm85_vm1, 1.0, %v1671_v16  ;;  %v1376_v18 = vsel %vm83_vm2, 1.0, %v1671_v16 }
  0x8b   :  { %98 = vst.msk [vmem:[#allocation2 + $0x10] sm:$0xff] %vm95_vm0, %v1378_v17  ;;  %96 = vst.msk [vmem:[#allocation2] sm:$0xff] %vm95_vm0, %v1376_v18 }
  0x8c   :  { %v82_v19 = vpop.permute.xlu1 %81  ;;  %v76_v20 = vpop.permute.xlu0 %75 }
  0x8d   :  { %vm86_vm3 = vcmp.eq.s32.totalorder %v66_v13, %v82_v19  ;;  %vm84_vm4 = vcmp.eq.s32.totalorder %v66_v13, %v76_v20 }
  0x8e   :  { %v1379_v21 = vsel %vm86_vm3, 1.0, %v1671_v16  ;;  %v1377_v22 = vsel %vm84_vm4, 1.0, %v1671_v16 }
  0x8f   :  { %99 = vst.msk [vmem:[#allocation2 + $0x18] sm:$0xff] %vm95_vm0, %v1379_v21  ;;  %97 = vst.msk [vmem:[#allocation2 + $0x8] sm:$0xff] %vm95_vm0, %v1377_v22 }
  0x90   :  { %v109_v23 = vpop.permute.xlu1 %108  ;;  %v106_v24 = vpop.permute.xlu0 %105 }
  0x91   :  { %vm117_vm5 = vcmp.eq.s32.totalorder %v66_v13, %v109_v23  ;;  %vm116_vm6 = vcmp.eq.s32.totalorder %v66_v13, %v106_v24 }
  0x92   :  { %v1381_v25 = vsel %vm117_vm5, 1.0, %v1671_v16  ;;  %v1380_v26 = vsel %vm116_vm6, 1.0, %v1671_v16 }
  0x93   :  { %129 = vst.msk [vmem:[#allocation3 + $0x8] sm:$0xff] %vm95_vm0, %v1381_v25  ;;  %128 = vst.msk [vmem:[#allocation3] sm:$0xff] %vm95_vm0, %v1380_v26 }
  0x94   :  { %v115_v27 = vpop.permute.xlu1 %114  ;;  %v112_v28 = vpop.permute.xlu0 %111 }
  0x95   :  { %vm119_vm7 = vcmp.eq.s32.totalorder %v66_v13, %v115_v27  ;;  %vm118_vm8 = vcmp.eq.s32.totalorder %v66_v13, %v112_v28 }
  0x96   :  { %v1383_v29 = vsel %vm119_vm7, 1.0, %v1671_v16  ;;  %v1382_v30 = vsel %vm118_vm8, 1.0, %v1671_v16 }
  0x97   :  { %131 = vst.msk [vmem:[#allocation3 + $0x18] sm:$0xff] %vm95_vm0, %v1383_v29  ;;  %130 = vst.msk [vmem:[#allocation3 + $0x10] sm:$0xff] %vm95_vm0, %v1382_v30 }
  0x98   :  { %v143_v33 = vpop.permute.xlu1 %142  ;;  %v138_v34 = vpop.permute.xlu0 %137 }
  0x99   :  { %v152_v35 = vmul.f32 %v1384_v31, %v143_v33  ;;  %v151_v36 = vmul.f32 %v1384_v31, %v138_v34 }
  0x9b   :  { %v161_v37 = vadd.f32 %v1385_v32, %v152_v35   ;;  %v160_v38 = vadd.f32 %v1385_v32, %v151_v36  }
  0x9c LB: > { %v1672_v39 = vmov 0.0   ;;  %vm1673_vm9 = vmmov 0   ;;  %s1854_s4 = sshll.u32 %s1656_s3, 4  ;;  %v170_v42 = vpack.c.bf16 %v1648_v37, %v1652_v38  ;;  %vm190_vm10 = vcmask 261120   ;;  %v239_v43 = vld [vmem:[#allocation3] sm:$0xff]  ;;  %s1674_s0 = smov 96   ;;  %s1656_s3 = sphi %s1839_s3, %s167_s3   ;;  %v1652_v38 = vphi %v160_v38, %v2199_v38   ;;  %v1648_v37 = vphi %v161_v37, %v2198_v37  }
  0x9d   : > { %1461 = vmatprep.subr.bf16.mxu0 %v1672_v39  ;;  %1465 = vmatprep.mubr.msk.bf16.mxu0 %vm1673_vm9, %v1672_v39  ;;  %s173_s21 = scalar_lea.vmem %s2170_s6, %s1854_s4  ;;  %s1864_s22 = scalar_lea.vmem %s2173_s9, %s1854_s4  ;;  %v446_v50 = vld [vmem:[%s2169_s1 + $0x8] sm:$0xff]  ;;  %v1675_v51 = vmov 0   ;;  %v445_v52 = vld [vmem:[%s2169_s1] sm:$0xff]  ;;  %v447_v53 = vld [vmem:[%s2169_s1 + $0x10] sm:$0xff] }
  0x9e   : > { %v1603_v40 = vld [vmem:[%s173_s21] sm:$0xff]   ;;  %v1604_v41 = vld [vmem:[%s173_s21 + $0x8] sm:$0xff]   ;;  %1473 = vmatprep.mubr.msk.f32.mxu1 %vm95_vm0, %v239_v43  ;;  %1602 = vset.pattern.permute.xlu1 %v1675_v51  ;;  %v448_v54 = vld [vmem:[%s2169_s1 + $0x18] sm:$0xff]  ;;  %s449_s21 = scalar_lea.vmem %s2171_s7, %s1656_s3  ;;  %s509_s24 = scalar_lea.vmem %s2174_s10, %s1656_s3 }
  0x9f   : > { %1462 = vmatpush3.bf16.msra.mxu0 %v1603_v40  ;;  %1601 = vset.pattern.permute.xlu0 %v1675_v51  ;;  %v240_v59 = vld [vmem:[#allocation3 + $0x8] sm:$0xff]  ;;  %v241_v60 = vld [vmem:[#allocation3 + $0x10] sm:$0xff]  ;;  %v242_v61 = vld [vmem:[#allocation3 + $0x18] sm:$0xff]  ;;  %v1912_v51 = vmov 0.0   ;;  %s1914_s25 = smov 0  }
  0xa0   : > { %1463 = vmatprep.subr.bf16.mxu0 %v1672_v39  ;;  %458 = vperm.xlu1 %1602, %v446_v50   ;;  %v235_v62 = vld [vmem:[#allocation2] sm:$0xff]  ;;  %v236_v63 = vld [vmem:[#allocation2 + $0x8] sm:$0xff]  ;;  %v237_v0 = vld [vmem:[#allocation2 + $0x10] sm:$0xff]  ;;  %v1910_v50 = vmov 0.0  }
  0xa1   : > { %v238_v1 = vld [vmem:[#allocation2 + $0x18] sm:$0xff]  ;;  %v1605_v2 = vld [vmem:[%s1864_s22] sm:$0xff]   ;;  %v1606_v3 = vld [vmem:[%s1864_s22 + $0x8] sm:$0xff]  }
  0xa2   : > { %v1399_v7 = vld [vmem:[%s449_s21] ss:$0 sm:$0xff] }
  0xa3   : > { %1464 = vmatpush3.bf16.msra.mxu0 %v1604_v41  ;;  %v1402_v34 = vld [vmem:[%s509_s24] ss:$0 sm:$0xff] }
  0xa4   : > { %463 = vperm.xlu1 %1602, %v447_v53   ;;  %1489 = vmatprep.subr.bf16.mxu0 %v1605_v2 }
  0xa6   : > { %1466 = vmatmul.mubr.msk.bf16.vlgmr.msra.gmra.mrb[0].mxu0 %vm190_vm10, %v170_v42 }
  0xa7   : > { %1490 = vmatpush3.bf16.msra.mxu0 %v1605_v2 }
  0xa8   : > { %468 = vperm.xlu1 %1602, %v448_v54   ;;  %1491 = vmatprep.subr.bf16.mxu0 %v1606_v3 }
  0xab   : > { %1492 = vmatpush3.bf16.msra.mxu0 %v1606_v3 }
 0x11f   : > { %v459_v4 = vpop.permute.xlu1 %458 }
 0x120   : > { %v478_v9 = vmul.f32 %v1399_v7, %v459_v4 }
 0x123   : > { %v464_v5 = vpop.permute.xlu1 %463 }
 0x124   : > { %v479_v20 = vmul.f32 %v1399_v7, %v464_v5 }
 0x127   : > { %v469_v10 = vpop.permute.xlu1 %468 }
 0x128   : > { %v480_v18 = vmul.f32 %v1399_v7, %v469_v10 }
 0x179   : > { %v228_v44 = vpop.f32.mrb[0].mxu0 }
 0x17a   : > { %v1467_v45 = vpop.f32.mrb[1].mxu0 }
 0x17b   : > { %v231_v46 = vpop.f32.mrb[2].mxu0 }
 0x17c   : > { %v1529_v47 = vpack.c.bf16 %v231_v46, %v228_v44  ;;  %v1468_v48 = vpop.f32.mrb[3].mxu0  ;;  %v1596_v49 = vpack.i.bf16 %v231_v46, %v228_v44 }
 0x17e   : > { %1597 = vrot.lane.b32.xlu0 %v1596_v49, %s1674_s0  ;;  %s485_s0 = scalar_lea.vmem %s2172_s8, %s1656_s3 }
 0x17f   : > { %v1400_v13 = vld [vmem:[%s485_s0] ss:$0 sm:$0xff] }
 0x182   : > { %453 = vperm.xlu0 %1601, %v445_v52  }
 0x1f0   : > { %v1598_v55 = vpop.permute.xlu0 %1597 }
 0x1f1   : > { %v1600_v56 = vunpack.i.h.bf16 %v1598_v55  ;;  %v1599_v57 = vunpack.i.l.bf16 %v1598_v55 }
 0x1f3   : > { %v1525_v58 = vpack.c.bf16 %v1600_v56, %v1599_v57 }
 0x1f5   : > { %1526 = vmatprep.subr.bf16.mxu1 %v1525_v58 }
 0x1f6   : > { %1528 = vmatpush3.bf16.msra.mxu1 %v1525_v58 }
 0x1f7   : > { %1530 = vmatprep.subr.bf16.mxu1 %v1529_v47 }
 0x1f9   : > { %1474 = vmatmul.mubr.msk.f32.vlgmr.msra.gmra.mrb[0].mxu1 %vm95_vm0, %v240_v59 }
 0x1fa   : > { %1532 = vmatpush3.bf16.msra.mxu1 %v1529_v47  ;;  %1476 = vmatprep.mubr.msk.f32.mxu1 %vm95_vm0, %v241_v60 }
 0x1fd   : > { %1477 = vmatmul.mubr.msk.f32.gmra.mrb[2].mxu1 %vm95_vm0, %v242_v61 }
 0x1fe   : > { %1483 = vmatprep.mubr.msk.f32.mxu1 %vm95_vm0, %v235_v62 }
 0x201   : > { %1484 = vmatmul.mubr.msk.f32.vlgmr.msra.gmra.mrb[0].mxu1 %vm95_vm0, %v236_v63  ;;  %v454_v6 = vpop.permute.xlu0 %453 }
 0x202   : > { %1486 = vmatprep.mubr.msk.f32.mxu1 %vm95_vm0, %v237_v0  ;;  %v477_v8 = vmul.f32 %v1399_v7, %v454_v6 }
 0x205   : > { %1487 = vmatmul.mubr.msk.f32.gmra.mrb[2].mxu1 %vm95_vm0, %v238_v1 }
 0x2d4   : > { %v1485_v11 = vpop.f32.mrb[0].mxu1 }
 0x2d5   : > { %v482_v14 = vadd.f32 %v1485_v11, %v478_v9  ;;  %v426_v15 = vpop.f32.mrb[1].mxu1 }
 0x2d6   : > { %v481_v17 = vadd.f32 %v477_v8, %v426_v15 }
 0x2d7   : > { %v494_v19 = vadd.f32 %v1400_v13, %v482_v14 }
 0x2d8   : > { %v493_v21 = vadd.f32 %v1400_v13, %v481_v17  ;;  %v1488_v22 = vpop.f32.mrb[2].mxu1 }
 0x2d9   : > { %v498_v23 = vmax.f32 %v494_v19, 0.0  ;;  %v484_v24 = vadd.f32 %v1488_v22, %v480_v18  ;;  %v436_v25 = vpop.f32.mrb[3].mxu1 }
 0x2da   : > { %v497_v26 = vmax.f32 %v493_v21, 0.0  ;;  %v483_v27 = vadd.f32 %v479_v20, %v436_v25 }
 0x2db   : > { %v496_v28 = vadd.f32 %v1400_v13, %v484_v24 }
 0x2dc   : > { %v501_v29 = vpack.c.bf16 %v498_v23, %v497_v26  ;;  %v495_v30 = vadd.f32 %v1400_v13, %v483_v27 }
 0x2dd   : > { %v500_v31 = vmax.f32 %v496_v28, 0.0 }
 0x2de   : > { %v499_v32 = vmax.f32 %v495_v30, 0.0  ;;  %1493 = vmatprep.mubr.msk.bf16.mxu0 %vm190_vm10, %v501_v29 }
 0x2e0   : > { %v502_v33 = vpack.c.bf16 %v500_v31, %v499_v32 }
 0x2e2   : > { %1494 = vmatmul.mubr.msk.bf16.vlgmr.msra.gmra.mrb[4].mxu0 %vm190_vm10, %v502_v33 }
 0x3b5   : > { %v1495_v35 = vpop.f32.mrb[4].mxu0 }
 0x3b6   : > { %v578_v36 = vadd.f32 %v1495_v35, %v1402_v34  ;;  %v569_v40 = vpop.f32.mrb[5].mxu0 }
 0x3b7   : > { %v570_v41 = vadd.f32 %v1402_v34, %v569_v40  ;;  %v1496_v42 = vpop.f32.mrb[6].mxu0 }
 0x3b8   : > { %v586_v43 = vmax.f32 %v578_v36, 0.0  ;;  %v581_v44 = vadd.f32 %v1496_v42, %v1402_v34  ;;  %v572_v45 = vpop.f32.mrb[7].mxu0 }
 0x3b9   : > { %v584_v46 = vmax.f32 %v570_v41, 0.0  ;;  %v573_v47 = vadd.f32 %v1402_v34, %v572_v45 }
 0x3ba   : > { %590 = vst.msk [vmem:[#allocation4 + $0x10] sm:$0xff] %vm190_vm10, %v586_v43  ;;  %v587_v48 = vmax.f32 %v581_v44, 0.0 }
 0x3bb   : > { %588 = vst.msk [vmem:[#allocation4] sm:$0xff] %vm190_vm10, %v584_v46  ;;  %v585_v49 = vmax.f32 %v573_v47, 0.0 }
 0x3bc   : > { %591 = vst.msk [vmem:[#allocation4 + $0x18] sm:$0xff] %vm190_vm10, %v587_v48 }
 0x3bd   : > { %589 = vst.msk [vmem:[#allocation4 + $0x8] sm:$0xff] %vm190_vm10, %v585_v49 }
 0x3be LB: >> { %v1926_v52 = vshrl.u32 %v65_v12, 7  ;;  %v1676_v53 = vmov 1966171168   ;;  %s1407_s18 = sshll.u32 %s1668_s25, 4  ;;  %s597_s25 = sadd.s32 1, %s1668_s25   ;;  %s1668_s25 = sphi %s1914_s25, %s597_s25   ;;  %v1664_v51 = vphi %v1912_v51, %v2197_v51   ;;  %v1660_v50 = vphi %v1910_v50, %v2196_v50  }
 0x3bf   : >> { %v787_v54 = vunpack.c.l.s4 %v1676_v53  ;;  %s1933_s26 = scalar_lea.vmem [#allocation2], %s1407_s18  ;;  %s1940_s27 = scalar_lea.vmem [#allocation4], %s1407_s18 }
 0x3c0   : >> { %v1930_v55 = vsub.s32 0, %v1926_v52  ;;  %v620_v56 = vsub.s32 1, %v1926_v52  ;;  %v602_v57 = vld [vmem:[%s1933_s26] sm:$0xff]  ;;  %v631_v61 = vsub.s32 2, %v1926_v52  ;;  %v642_v1 = vsub.s32 3, %v1926_v52  ;;  %v603_v45 = vld [vmem:[%s1933_s26 + $0x8] sm:$0xff] }
 0x3c1   : >> { %v788_v60 = vunpack.c.0.s8 %v787_v54  ;;  %v653_v10 = vsub.s32 4, %v1926_v52  ;;  %v664_v26 = vsub.s32 5, %v1926_v52  ;;  %v675_v33 = vsub.s32 6, %v1926_v52  ;;  %p594_p0 = scmp.ge.s32.totalorder %s597_s25, 2  }
 0x3c2   : >> { %v621_v58 = vrot.slane %v602_v57, %v620_v56  ;;  %v610_v59 = vrot.slane %v602_v57, %v1930_v55  ;;  %v632_v2 = vrot.slane %v602_v57, %v631_v61  ;;  %v643_v9 = vrot.slane %v602_v57, %v642_v1  ;;  %1497 = vmatprep.subr.bf16.mxu1 (%p594_p0), %v1672_v39  ;;  %s1429_s28 = sshll.u32 (%p594_p0), %s1656_s3, 5  ;;  %s1677_s21 = smov (%p594_p0), 32  }
 0x3c3   : >> { %v1944_v63 = vsub.s32 %v788_v60, %v1926_v52  ;;  %v654_v25 = vrot.slane %v602_v57, %v653_v10  ;;  %v665_v32 = vrot.slane %v602_v57, %v664_v26  ;;  %v676_v40 = vrot.slane %v602_v57, %v675_v33  ;;  %1505 = vmatprep.mubr.msk.bf16.mxu1 (%p594_p0), %vm1673_vm9, %v1672_v39  ;;  %s1072_s30 = scalar_lea.vmem (%p594_p0), %s2175_s11, %s1429_s28  ;;  %s1162_s0 = scalar_lea.vmem (%p594_p0), %s2177_s13, %s1854_s4 }
 0x3c4   : >> { %623 = vbcast.lane.b32.xlu1 %v621_v58, 256  ;;  %612 = vbcast.lane.b32.xlu0 %v610_v59, 256  ;;  %v605_v62 = vld [vmem:[%s1940_s27] sm:$0xff]  ;;  %v606_v28 = vld [vmem:[%s1940_s27 + $0x8] sm:$0xff]  ;;  %v686_v41 = vsub.s32 7, %v1926_v52  ;;  %v698_v49 = vrot.slane %v603_v45, %v1930_v55  ;;  %vm1113_vm11 = vcmask (%p594_p0), 523264   ;;  %s1081_s24 = scalar_lea.vmem (%p594_p0), %s2176_s12, %s1656_s3  ;;  %s1167_s18 = scalar_lea.vmem (%p594_p0), %s2178_s14, %s1656_s3 }
 0x3c5   : >> { %v785_v0 = vcombine.high %v605_v62, %v605_v62  ;;  %v792_v3 = vrot.slane %v605_v62, %v1944_v63  ;;  %v841_v30 = vrot.slane %v606_v28, %v1944_v63  ;;  %v834_v48 = vcombine.high %v606_v28, %v606_v28  ;;  %1509 = vmatprep.subr.bf16.mxu0 (%p594_p0), %v1672_v39  ;;  %s167_s3 = sadd.s32 (%p594_p0), 1, %s1656_s3  }
 0x3c6   : >> { %v687_v44 = vrot.slane %v602_v57, %v686_v41  ;;  %v709_v57 = vrot.slane %v603_v45, %v620_v56  ;;  %v731_v56 = vrot.slane %v603_v45, %v642_v1  ;;  %v775_v1 = vrot.slane %v603_v45, %v686_v41  ;;  %1513 = vmatprep.mubr.msk.bf16.mxu0 (%p594_p0), %vm1673_vm9, %v1672_v39  ;;  %p164_p1 = scmp.ge.s32.totalorder (%p594_p0), %s167_s3, 4  }
 0x3c7   : >> { %v799_v4 = vrot.slane %v785_v0, %v1944_v63  ;;  %v800_v5 = vcombine.high %v792_v3, %v792_v3  ;;  %v808_v6 = vrot.slane %v792_v3, %v1944_v63  ;;  %v857_v31 = vrot.slane %v841_v30, %v1944_v63 }
 0x3c8   : >> { %627 = vbcast.lane.b32.xlu1 %v621_v58, 264  ;;  %616 = vbcast.lane.b32.xlu0 %v610_v59, 264  ;;  %v849_v35 = vcombine.high %v841_v30, %v841_v30  ;;  %v848_v54 = vrot.slane %v834_v48, %v1944_v63  ;;  %v720_v0 = vrot.slane %v603_v45, %v631_v61 }
 0x3c9   : >> { %v815_v7 = vrot.slane %v799_v4, %v1944_v63  ;;  %v801_v8 = vcombine.high %v799_v4, %v799_v4  ;;  %v822_v11 = vrot.slane %v800_v5, %v1944_v63  ;;  %v1958_v13 = vrot.slane %v808_v6, %v1930_v55 }
 0x3ca   : >> { %v830_v14 = vcombine.high %v808_v6, %v808_v6  ;;  %v1990_v34 = vrot.slane %v857_v31, %v1930_v55  ;;  %v871_v36 = vrot.slane %v849_v35, %v1944_v63  ;;  %v879_v43 = vcombine.high %v857_v31, %v857_v31 }
 0x3cb   : >> { %v1961_v15 = vrot.slane %v815_v7, %v1930_v55  ;;  %v829_v17 = vrot.slane %v801_v8, %v1944_v63  ;;  %v831_v18 = vcombine.high %v815_v7, %v815_v7  ;;  %v1965_v19 = vrot.slane %v822_v11, %v1930_v55 }
 0x3cc   : >> { %638 = vbcast.lane.b32.xlu1 %v632_v2, 264  ;;  %634 = vbcast.lane.b32.xlu0 %v632_v2, 256  ;;  %v1968_v20 = vrot.slane %v830_v14, %v1930_v55  ;;  %v832_v21 = vcombine.high %v822_v11, %v822_v11  ;;  %v1995_v42 = vrot.slane %v871_v36, %v1930_v55 }
 0x3cd   : >> { %v1971_v22 = vrot.slane %v829_v17, %v1930_v55  ;;  %v1974_v23 = vrot.slane %v831_v18, %v1930_v55  ;;  %v833_v24 = vcombine.high %v829_v17, %v829_v17  ;;  %v1999_v46 = vrot.slane %v879_v43, %v1930_v55 }
 0x3ce   : >> { %v1980_v27 = vrot.slane %v832_v21, %v1930_v55  ;;  %v881_v47 = vcombine.high %v871_v36, %v871_v36  ;;  %v864_v58 = vrot.slane %v848_v54, %v1944_v63  ;;  %v850_v60 = vcombine.high %v848_v54, %v848_v54 }
 0x3cf   : >> { %v1984_v29 = vrot.slane %v833_v24, %v1930_v55  ;;  %v753_v6 = vrot.slane %v603_v45, %v664_v26  ;;  %v764_v7 = vrot.slane %v603_v45, %v675_v33 }
 0x3d0   : >> { %649 = vbcast.lane.b32.xlu1 %v643_v9, 264  ;;  %645 = vbcast.lane.b32.xlu0 %v643_v9, 256  ;;  %v2003_v53 = vrot.slane %v881_v47, %v1930_v55  ;;  %v2010_v59 = vrot.slane %v864_v58, %v1930_v55  ;;  %v878_v62 = vrot.slane %v850_v60, %v1944_v63 }
 0x3d1   : >> { %v880_v3 = vcombine.high %v864_v58, %v864_v58  ;;  %v742_v63 = vrot.slane %v603_v45, %v653_v10 }
 0x3d2   : >> { %v2016_v2 = vrot.slane %v878_v62, %v1930_v55  ;;  %v882_v5 = vcombine.high %v878_v62, %v878_v62 }
 0x3d3   : >> { %v2021_v4 = vrot.slane %v880_v3, %v1930_v55 }
 0x3d4   : >> { %660 = vbcast.lane.b32.xlu1 %v654_v25, 264  ;;  %656 = vbcast.lane.b32.xlu0 %v654_v25, 256  ;;  %v2026_v61 = vrot.slane %v882_v5, %v1930_v55 }
 0x3d8   : >> { %671 = vbcast.lane.b32.xlu1 %v665_v32, 264  ;;  %667 = vbcast.lane.b32.xlu0 %v665_v32, 256 }
 0x3dc   : >> { %682 = vbcast.lane.b32.xlu1 %v676_v40, 264  ;;  %678 = vbcast.lane.b32.xlu0 %v676_v40, 256 }
 0x3e0   : >> { %693 = vbcast.lane.b32.xlu1 %v687_v44, 264  ;;  %689 = vbcast.lane.b32.xlu0 %v687_v44, 256 }
 0x3e4   : >> { %704 = vbcast.lane.b32.xlu1 %v698_v49, 264  ;;  %700 = vbcast.lane.b32.xlu0 %v698_v49, 256 }
 0x3e8   : >> { %715 = vbcast.lane.b32.xlu1 %v709_v57, 264  ;;  %711 = vbcast.lane.b32.xlu0 %v709_v57, 256 }
 0x3ec   : >> { %726 = vbcast.lane.b32.xlu1 %v720_v0, 264  ;;  %722 = vbcast.lane.b32.xlu0 %v720_v0, 256 }
 0x3f0   : >> { %737 = vbcast.lane.b32.xlu1 %v731_v56, 264  ;;  %733 = vbcast.lane.b32.xlu0 %v731_v56, 256 }
 0x3f4   : >> { %748 = vbcast.lane.b32.xlu1 %v742_v63, 264  ;;  %744 = vbcast.lane.b32.xlu0 %v742_v63, 256 }
 0x3f8   : >> { %759 = vbcast.lane.b32.xlu1 %v753_v6, 264  ;;  %755 = vbcast.lane.b32.xlu0 %v753_v6, 256 }
 0x3fc   : >> { %770 = vbcast.lane.b32.xlu1 %v764_v7, 264  ;;  %766 = vbcast.lane.b32.xlu0 %v764_v7, 256 }
 0x400   : >> { %781 = vbcast.lane.b32.xlu1 %v775_v1, 264  ;;  %777 = vbcast.lane.b32.xlu0 %v775_v1, 256 }
 0x436   : >> { %v624_v8 = vpop.permute.xlu1 %623  ;;  %v613_v9 = vpop.permute.xlu0 %612 }
 0x437   : >> { %v963_v52 = vmul.f32 %v1958_v13, %v613_v9  ;;  %v965_v24 = vmul.f32 %v1965_v19, %v624_v8 }
 0x439   : >> { %v995_v25 = vsel %vm190_vm10, %v963_v52, -inf  ;;  %v996_v40 = vsel %vm190_vm10, %v965_v24, -inf }
 0x43a   : >> { %v628_v11 = vpop.permute.xlu1 %627  ;;  %v617_v14 = vpop.permute.xlu0 %616 }
 0x43b   : >> { %v964_v55 = vmul.f32 %v1958_v13, %v617_v14  ;;  %v966_v26 = vmul.f32 %v1965_v19, %v628_v11 }
 0x43d   : >> { %v1026_v28 = vsel %vm190_vm10, %v964_v55, -inf  ;;  %v1027_v41 = vsel %vm190_vm10, %v966_v26, -inf }
 0x43e   : >> { %v639_v10 = vpop.permute.xlu1 %638  ;;  %v635_v17 = vpop.permute.xlu0 %634 }
 0x43f   : >> { %v968_v18 = vmul.f32 %v1968_v20, %v639_v10  ;;  %v967_v21 = vmul.f32 %v1968_v20, %v635_v17 }
 0x441   : >> { %v1028_v30 = vsel %vm190_vm10, %v968_v18, -inf  ;;  %v997_v31 = vsel %vm190_vm10, %v967_v21, -inf }
 0x442   : >> { %v1029_v32 = vmax.f32 %v1026_v28, %v1028_v30  ;;  %v998_v13 = vmax.f32 %v995_v25, %v997_v31  ;;  %v650_v33 = vpop.permute.xlu1 %649  ;;  %v646_v35 = vpop.permute.xlu0 %645 }
 0x443   : >> { %v970_v36 = vmul.f32 %v1980_v27, %v650_v33  ;;  %v969_v20 = vmul.f32 %v1980_v27, %v646_v35 }
 0x445   : >> { %v1030_v19 = vsel %vm190_vm10, %v970_v36, -inf  ;;  %v999_v43 = vsel %vm190_vm10, %v969_v20, -inf }
 0x446   : >> { %v1031_v44 = vmax.f32 %v1027_v41, %v1030_v19  ;;  %v1000_v45 = vmax.f32 %v996_v40, %v999_v43  ;;  %v661_v47 = vpop.permute.xlu1 %660  ;;  %v657_v48 = vpop.permute.xlu0 %656 }
 0x447   : >> { %v972_v49 = vmul.f32 %v1961_v15, %v661_v47  ;;  %v971_v54 = vmul.f32 %v1961_v15, %v657_v48 }
 0x449   : >> { %v1032_v58 = vsel %vm190_vm10, %v972_v49, -inf  ;;  %v1001_v27 = vsel %vm190_vm10, %v971_v54, -inf }
 0x44a   : >> { %v1033_v57 = vmax.f32 %v1029_v32, %v1032_v58  ;;  %v1002_v60 = vmax.f32 %v998_v13, %v1001_v27  ;;  %v672_v62 = vpop.permute.xlu1 %671  ;;  %v668_v0 = vpop.permute.xlu0 %667 }
 0x44b   : >> { %v974_v3 = vmul.f32 %v1971_v22, %v672_v62  ;;  %v973_v56 = vmul.f32 %v1971_v22, %v668_v0 }
 0x44d   : >> { %v1034_v5 = vsel %vm190_vm10, %v974_v3, -inf  ;;  %v1003_v63 = vsel %vm190_vm10, %v973_v56, -inf }
 0x44e   : >> { %v1035_v6 = vmax.f32 %v1031_v44, %v1034_v5  ;;  %v1004_v7 = vmax.f32 %v1000_v45, %v1003_v63  ;;  %v683_v1 = vpop.permute.xlu1 %682  ;;  %v679_v15 = vpop.permute.xlu0 %678 }
 0x44f   : >> { %v976_v8 = vmul.f32 %v1974_v23, %v683_v1  ;;  %v975_v9 = vmul.f32 %v1974_v23, %v679_v15 }
 0x451   : >> { %v1036_v11 = vsel %vm190_vm10, %v976_v8, -inf  ;;  %v1005_v14 = vsel %vm190_vm10, %v975_v9, -inf }
 0x452   : >> { %v1037_v52 = vmax.f32 %v1033_v57, %v1036_v11  ;;  %v1006_v55 = vmax.f32 %v1002_v60, %v1005_v14  ;;  %v694_v10 = vpop.permute.xlu1 %693  ;;  %v690_v22 = vpop.permute.xlu0 %689 }
 0x453   : >> { %v978_v17 = vmul.f32 %v1984_v29, %v694_v10  ;;  %v977_v18 = vmul.f32 %v1984_v29, %v690_v22 }
 0x455   : >> { %v1038_v21 = vsel %vm190_vm10, %v978_v17, -inf  ;;  %v1007_v24 = vsel %vm190_vm10, %v977_v18, -inf }
 0x456   : >> { %v1039_v25 = vmax.f32 %v1035_v6, %v1038_v21  ;;  %v1008_v26 = vmax.f32 %v1004_v7, %v1007_v24  ;;  %v705_v28 = vpop.permute.xlu1 %704  ;;  %v701_v23 = vpop.permute.xlu0 %700 }
 0x457   : >> { %v980_v30 = vmul.f32 %v1990_v34, %v705_v28  ;;  %v979_v31 = vmul.f32 %v1990_v34, %v701_v23 }
 0x459   : >> { %v1040_v32 = vsel %vm190_vm10, %v980_v30, -inf  ;;  %v1009_v13 = vsel %vm190_vm10, %v979_v31, -inf }
 0x45a   : >> { %v1041_v33 = vmax.f32 %v1037_v52, %v1040_v32  ;;  %v1010_v35 = vmax.f32 %v1006_v55, %v1009_v13  ;;  %v716_v36 = vpop.permute.xlu1 %715  ;;  %v712_v29 = vpop.permute.xlu0 %711 }
 0x45b   : >> { %v982_v20 = vmul.f32 %v1995_v42, %v716_v36  ;;  %v981_v40 = vmul.f32 %v1995_v42, %v712_v29 }
 0x45d   : >> { %v1042_v41 = vsel %vm190_vm10, %v982_v20, -inf  ;;  %v1011_v19 = vsel %vm190_vm10, %v981_v40, -inf }
 0x45e   : >> { %v1043_v43 = vmax.f32 %v1039_v25, %v1042_v41  ;;  %v1012_v44 = vmax.f32 %v1008_v26, %v1011_v19  ;;  %v727_v45 = vpop.permute.xlu1 %726  ;;  %v723_v34 = vpop.permute.xlu0 %722  ;;  %v1616_v41 = vld [vmem:[%s1072_s30 + $0x10] sm:$0xff] (%p594_p0)   ;;  %v1617_v19 = vld [vmem:[%s1072_s30 + $0x18] sm:$0xff] (%p594_p0)  }
 0x45f   : >> { %v984_v47 = vmul.f32 %v1999_v46, %v727_v45  ;;  %v983_v48 = vmul.f32 %v1999_v46, %v723_v34 }
 0x461   : >> { %v1044_v49 = vsel %vm190_vm10, %v984_v47, -inf  ;;  %v1013_v54 = vsel %vm190_vm10, %v983_v48, -inf }
 0x462   : >> { %v1045_v58 = vmax.f32 %v1041_v33, %v1044_v49  ;;  %v1014_v27 = vmax.f32 %v1010_v35, %v1013_v54  ;;  %v738_v57 = vpop.permute.xlu1 %737  ;;  %v734_v42 = vpop.permute.xlu0 %733  ;;  %v1618_v49 = vld [vmem:[%s1162_s0] sm:$0xff] (%p594_p0)   ;;  %v1619_v54 = vld [vmem:[%s1162_s0 + $0x8] sm:$0xff] (%p594_p0)  }
 0x463   : >> { %v986_v60 = vmul.f32 %v2003_v53, %v738_v57  ;;  %v985_v62 = vmul.f32 %v2003_v53, %v734_v42  ;;  %1510 = vmatpush3.bf16.msra.mxu0 (%p594_p0), %v1618_v49 }
 0x464   : > { %1511 = vmatprep.subr.bf16.mxu0 (%p594_p0), %v1672_v39 }
 0x465   : >> { %v1046_v0 = vsel %vm190_vm10, %v986_v60, -inf  ;;  %v1015_v3 = vsel %vm190_vm10, %v985_v62, -inf }
 0x466   : >> { %v1047_v56 = vmax.f32 %v1043_v43, %v1046_v0  ;;  %v1016_v5 = vmax.f32 %v1012_v44, %v1015_v3  ;;  %v749_v63 = vpop.permute.xlu1 %748  ;;  %v745_v46 = vpop.permute.xlu0 %744 }
 0x467   : >> { %v988_v6 = vmul.f32 %v2010_v59, %v749_v63  ;;  %v987_v7 = vmul.f32 %v2010_v59, %v745_v46  ;;  %1512 = vmatpush3.bf16.msra.mxu0 (%p594_p0), %v1619_v54 }
 0x469   : >> { %v1048_v1 = vsel %vm190_vm10, %v988_v6, -inf  ;;  %v1017_v15 = vsel %vm190_vm10, %v987_v7, -inf }
 0x46a   : >> { %v1049_v8 = vmax.f32 %v1045_v58, %v1048_v1  ;;  %v1018_v9 = vmax.f32 %v1014_v27, %v1017_v15  ;;  %v760_v11 = vpop.permute.xlu1 %759  ;;  %v756_v53 = vpop.permute.xlu0 %755  ;;  %v1410_v58 = vld [vmem:[%s1081_s24] ss:$0 sm:$0xff] (%p594_p0) }
 0x46b   : >> { %v990_v14 = vmul.f32 %v2016_v2, %v760_v11  ;;  %v989_v52 = vmul.f32 %v2016_v2, %v756_v53 }
 0x46d   : >> { %v1050_v55 = vsel %vm190_vm10, %v990_v14, -inf  ;;  %v1019_v10 = vsel %vm190_vm10, %v989_v52, -inf }
 0x46e   : >> { %v1051_v22 = vmax.f32 %v1047_v56, %v1050_v55  ;;  %v1020_v17 = vmax.f32 %v1016_v5, %v1019_v10  ;;  %v771_v18 = vpop.permute.xlu1 %770  ;;  %v767_v59 = vpop.permute.xlu0 %766 }
 0x46f   : >> { %v992_v21 = vmul.f32 %v2021_v4, %v771_v18  ;;  %v991_v24 = vmul.f32 %v2021_v4, %v767_v59 }
 0x471   : >> { %v1052_v25 = vsel %vm190_vm10, %v992_v21, -inf  ;;  %v1021_v26 = vsel %vm190_vm10, %v991_v24, -inf }
 0x472   : >> { %v1053_v28 = vmax.f32 %v1049_v8, %v1052_v25  ;;  %v1022_v23 = vmax.f32 %v1018_v9, %v1021_v26  ;;  %v782_v30 = vpop.permute.xlu1 %781  ;;  %v778_v2 = vpop.permute.xlu0 %777 }
 0x473   : >> { %v994_v31 = vmul.f32 %v2026_v61, %v782_v30  ;;  %v993_v32 = vmul.f32 %v2026_v61, %v778_v2 }
 0x475   : >> { %v1054_v13 = vsel %vm190_vm10, %v994_v31, -inf  ;;  %v1023_v33 = vsel %vm190_vm10, %v993_v32, -inf }
 0x476   : >> { %v1055_v35 = vmax.f32 %v1051_v22, %v1054_v13  ;;  %v1024_v36 = vmax.f32 %v1020_v17, %v1023_v33  ;;  %596 = sbr.rel (!%p594_p0) target bundleno = 958 (0x3be), region = 121 }
 0x478   : >> { %v1056_v29 = vmax.f32 %v1053_v28, %v1055_v35  ;;  %v1025_v4 = vmax.f32 %v1022_v23, %v1024_v36 }
 0x47a   : >> { %v1058_v20 = vmax.f32 %v1660_v50, %v1056_v29   ;;  %v1057_v40 = vmax.f32 %v1664_v51, %v1025_v4  }
 0x47c   : >> { %v2196_v50 = vmov %v1058_v20  ;;  %v2197_v51 = vmov %v1057_v40  ;;  %v1609_v61 = vpack.i.bf16 (%p594_p0), %v1058_v20, %v1057_v40 }
 0x47d   : > { %v1614_v51 = vld [vmem:[%s1072_s30] sm:$0xff]   ;;  %v1615_v50 = vld [vmem:[%s1072_s30 + $0x8] sm:$0xff]   ;;  %1517 = vmatprep.subr.bf16.mxu0 (%p164_p1), %v1671_v16  ;;  %vm1678_vm12 = vmmov (%p164_p1), 0   ;;  %vm1330_vm13 = vcmask (%p164_p1), 7168  }
 0x47e   : > { %1610 = vrot.lane.b32.xlu0 %v1609_v61, %s1677_s21  ;;  %1498 = vmatpush3.bf16.msra.mxu1 %v1614_v51  ;;  %v1620_v14 = vld [vmem:[%s2179_s15] sm:$0xff] (%p164_p1)  }
 0x47f   : > { %1499 = vmatprep.subr.bf16.mxu1 %v1672_v39  ;;  %v1421_v12 = vld [vmem:[%s2180_s16] ss:$0 sm:$0xff] (%p164_p1) }
 0x480   :  { %v1425_v17 = vld [vmem:[%s2181_s17] ss:$0 sm:$0xff] (%p164_p1) }
 0x481   :  { %v1426_v23 = vld [vmem:[#allocation5] ss:$0 sm:$0xff] (%p164_p1) }
 0x482   : > { %1500 = vmatpush3.bf16.msra.mxu1 %v1615_v50 }
 0x483   : > { %1501 = vmatprep.subr.bf16.mxu1 %v1672_v39 }
 0x486   : > { %1502 = vmatpush3.bf16.msra.mxu1 %v1616_v41 }
 0x487   : > { %1503 = vmatprep.subr.bf16.mxu1 %v1672_v39  ;;  %v1417_v39 = vld [vmem:[%s1167_s18] ss:$0 sm:$0xff] }
 0x48a   : > { %1504 = vmatpush3.bf16.msra.mxu1 %v1617_v19 }
 0x4f0   : > { %v1611_v43 = vpop.permute.xlu0 %1610 }
 0x4f1   : > { %v1613_v44 = vunpack.i.h.bf16 %v1611_v43  ;;  %v1612_v45 = vunpack.i.l.bf16 %v1611_v43 }
 0x4f3   : > { %v1068_v34 = vsel %vm190_vm10, %v1648_v37, %v1613_v44  ;;  %v1067_v47 = vsel %vm190_vm10, %v1652_v38, %v1612_v45 }
 0x4f4   : > { %v1069_v48 = vpack.c.bf16 %v1068_v34, %v1067_v47 }
 0x4f6   : > { %1506 = vmatmul.mubr.msk.bf16.vlgmr.msra.gmra.mrb[4].mxu1 %vm1113_vm11, %v1069_v48 }
 0x5c9   : > { %v1151_v27 = vpop.f32.mrb[4].mxu1 }
 0x5ca   : > { %v1152_v57 = vadd.f32 %v1410_v58, %v1151_v27  ;;  %v1507_v42 = vpop.f32.mrb[5].mxu1 }
 0x5cb   : > { %v1154_v60 = vpop.f32.mrb[6].mxu1 }
 0x5cc   : > { %v1155_v62 = vadd.f32 %v1410_v58, %v1154_v60  ;;  %v1508_v0 = vpop.f32.mrb[7].mxu1  ;;  %v1158_v3 = vmax.f32 %v1152_v57, 0.0 }
 0x5ce   : > { %v1159_v56 = vmax.f32 %v1155_v62, 0.0 }
 0x5d0   : > { %v1160_v5 = vpack.c.bf16 %v1159_v56, %v1158_v3 }
 0x5d2   : > { %1514 = vmatmul.mubr.msk.bf16.vlgmr.msra.gmra.mrb[8].mxu0 %vm190_vm10, %v1160_v5 }
 0x5d3   :  { %1521 = vmatprep.mubr.msk.bf16.mxu0 (%p164_p1), %vm1678_vm12, %v1671_v16  ;;  %1518 = vmatpush3.bf16.msra.mxu0 (%p164_p1), %v1620_v14 }
 0x5d4   :  { %1519 = vmatprep.subr.bf16.mxu0 (%p164_p1), %v1671_v16 }
 0x6a5   : > { %v1224_v63 = vpop.f32.mrb[8].mxu0 }
 0x6a6   : > { %v1225_v46 = vadd.f32 %v1417_v39, %v1224_v63  ;;  %v1515_v6 = vpop.f32.mrb[9].mxu0 }
 0x6a7   : > { %v1227_v7 = vpop.f32.mrb[10].mxu0 }
 0x6a8   : > { %v1231_v1 = vmax.f32 %v1225_v46, 0.0  ;;  %v1228_v15 = vadd.f32 %v1417_v39, %v1227_v7  ;;  %v1516_v8 = vpop.f32.mrb[11].mxu0  ;;  %166 = sbr.rel (!%p164_p1) target bundleno = 156 (0x9c), region = 132 }
 0x6aa   : > { %v1233_v9 = vadd.f32 %v1652_v38, %v1231_v1   ;;  %v1232_v11 = vmax.f32 %v1228_v15, 0.0 }
 0x6ac   : > { %v1234_v53 = vadd.f32 %v1648_v37, %v1232_v11   ;;  %v2199_v38 = vmov %v1233_v9 }
 0x6ad   :  { %v1621_v38 = vld [vmem:[%s2179_s15 + $0x8] sm:$0xff] (%p164_p1)  }
 0x6ae   : > { %v2198_v37 = vmov %v1234_v53  ;;  %v1235_v52 = vpack.c.bf16 (%p164_p1), %v1234_v53, %v1233_v9  ;;  %1520 = vmatpush3.bf16.msra.mxu0 (%p164_p1), %v1621_v38 }
 0x6b1   :  { %1522 = vmatmul.mubr.msk.bf16.vlgmr.msra.gmra.mrb[0].mxu0 %vm190_vm10, %v1235_v52 }
 0x784   :  { %v1297_v37 = vpop.f32.mrb[0].mxu0 }
 0x785   :  { %v1298_v55 = vadd.f32 %v1421_v12, %v1297_v37  ;;  %v1523_v10 = vpop.f32.mrb[1].mxu0 }
 0x786   :  { %v1300_v22 = vpop.f32.mrb[2].mxu0 }
 0x787   :  { %v1304_v18 = vmax.f32 %v1298_v55, 0.0  ;;  %v1301_v59 = vadd.f32 %v1421_v12, %v1300_v22  ;;  %v1524_v21 = vpop.f32.mrb[3].mxu0 }
 0x789   :  { %v1305_v16 = vmax.f32 %v1301_v59, 0.0  ;;  %v1313_v24 = vmul.f32 %v1425_v17, %v1304_v18 }
 0x78b   :  { %v1315_v25 = vsel %vm190_vm10, %v1313_v24, 0.0  ;;  %v1314_v26 = vmul.f32 %v1425_v17, %v1305_v16 }
 0x78c   :  { %1316 = vadd.xlane.f32.xlu0 %v1315_v25 }
 0x78d   :  { %v1318_v28 = vsel %vm190_vm10, %v1314_v26, 0.0 }
 0x790   :  { %1319 = vadd.xlane.f32.xlu0 %v1318_v28 }
 0x819   :  { %v1317_v30 = vpop.xlane.xlu0 %1316 }
 0x81a   :  { %v1328_v2 = vadd.f32 %v1426_v23, %v1317_v30 }
 0x81c   :  { %1331 = vst.msk [vmem:[%s2182_s19] sm:$0xff] %vm1330_vm13, %v1328_v2 }
 0x81d   :  { %v1320_v31 = vpop.xlane.xlu0 %1319 }
 0x81e   :  { %v1329_v32 = vadd.f32 %v1426_v23, %v1320_v31 }
 0x820   :  { %1332 = vst.msk [vmem:[%s2182_s19 + $0x8] sm:$0xff] %vm1330_vm13, %v1329_v32 }

</bundles_post_ra>
